<compile_context>
chip_gen: v6e
topology: v6e:2x2x1
jax: 0.10.0
libtpu: 0.0.40
codegen_flags: <defaults>
</compile_context>

<pallas_src>
import functools

import jax
import jax.numpy as jnp
from jax import lax
from jax.experimental import pallas as pl
from jax.experimental.pallas import tpu as pltpu


_NEG_INF = -1e30  # finite mask value: exp(_NEG_INF - m) underflows to 0.0, no NaNs


# --------------------------------------------------------------------------
# Hardware-derived knobs & small helpers
# --------------------------------------------------------------------------

@functools.lru_cache(maxsize=None)
def _vmem_limit_bytes():
    """~3/4 of physical VMEM: ~96 MiB on v5e/v6e (128 MiB), ~48 MiB on v7x (64 MiB)."""
    cap = None
    try:
        cap = getattr(pltpu.get_tpu_info(), "vmem_capacity_bytes", None)
    except Exception:
        cap = None
    if not cap:
        cap = 64 * 1024 * 1024          # conservative fallback (v7x physical per-TC)
    return int(cap) * 3 // 4


def _default_proj_tm():
    # 512-row projection tiles on big-VMEM parts (v5e/v6e); 256 on v7x.
    return 512 if _vmem_limit_bytes() >= (64 << 20) else 256


def _sublane(dtype):
    """Rows per packed sublane group: 8 for f32, 16 for bf16, 32 for int8."""
    return max(8, 32 // jnp.dtype(dtype).itemsize)


def _round_up(n, m):
    return ((n + m - 1) // m) * m


def _pick_tile(dim, target, sublane=8):
    """Largest tile <= target dividing dim; prefers multiples of 128, then of the
    (dtype-aware) sublane count; falls back to the full dim."""
    if dim <= target:
        return dim
    for align in (128, sublane):
        t = (target // align) * align
        while t >= align:
            if dim % t == 0:
                return t
            t -= align
    return dim


def _pad_tokens(arr, target_len):
    """Zero-pad axis 1 (tokens) of a (B, T, D) array up to target_len."""
    t = arr.shape[1]
    if t == target_len:
        return arr
    return jnp.pad(arr, ((0, 0), (0, target_len - t), (0, 0)))


# --------------------------------------------------------------------------
# Single-buffering probe for resident (constant index_map) blocks
# --------------------------------------------------------------------------

_BUFFERED_ONE_OK = None


def _buffered_one_supported():
    """pipeline_mode=pl.Buffered(1) halves the VMEM footprint of blocks whose index_map
    is constant (weights / bias).  Probe once with a tiny kernel; fall back silently."""
    global _BUFFERED_ONE_OK
    if _BUFFERED_ONE_OK is None:
        try:
            def _probe(x_ref, w_ref, o_ref):
                o_ref[...] = x_ref[...] + w_ref[...]

            f = pl.pallas_call(
                _probe,
                out_shape=jax.ShapeDtypeStruct((16, 128), jnp.float32),
                grid_spec=pltpu.PrefetchScalarGridSpec(
                    num_scalar_prefetch=0,
                    grid=(2,),
                    in_specs=[
                        pl.BlockSpec((8, 128), lambda i: (i, 0)),
                        pl.BlockSpec((8, 128), lambda i: (0, 0),
                                     pipeline_mode=pl.Buffered(1)),
                    ],
                    out_specs=pl.BlockSpec((8, 128), lambda i: (i, 0)),
                ),
            )
            x = jnp.arange(16 * 128, dtype=jnp.float32).reshape(16, 128)
            w = jnp.ones((8, 128), jnp.float32)
            y = jax.block_until_ready(f(x, w))
            _BUFFERED_ONE_OK = bool(jnp.allclose(y, x + 1.0))
        except Exception:
            _BUFFERED_ONE_OK = False
    return _BUFFERED_ONE_OK


def _resident_spec(block_shape, index_map):
    """BlockSpec for a block that is identical at every grid step (weights/bias)."""
    if _buffered_one_supported():
        return pl.BlockSpec(block_shape, index_map, pipeline_mode=pl.Buffered(1))
    return pl.BlockSpec(block_shape, index_map)


# --------------------------------------------------------------------------
# Pallas kernels
# --------------------------------------------------------------------------

def _proj_kernel(x_ref, w_ref, *out_refs, heads, dim_head):
    # x: (1, TM, Din); w: (Din, n*H*d) resident.
    # out_refs[j]: (1, H, TM, d)  -- HEAD-MAJOR so attention never slices heads from lanes.
    x = x_ref[0]
    hd = heads * dim_head
    for j, o_ref in enumerate(out_refs):
        # One f32 chunk per output tensor: live intermediate is (TM, H*d), not
        # (TM, n*H*d) -- avoids vreg spill round trips; MXU work is identical.
        y = jnp.dot(x, w_ref[:, j * hd:(j + 1) * hd],
                    preferred_element_type=jnp.float32)
        for h in range(heads):
            o_ref[0, h] = y[:, h * dim_head:(h + 1) * dim_head].astype(o_ref.dtype)


def _out_proj_kernel(x_ref, w_ref, b_ref, o_ref):
    # x: (1, TM, H*d); w: (H*d, Dq) resident; b: (1, Dq) resident -> o: (1, TM, Dq)
    acc = jnp.dot(x_ref[0], w_ref[...], preferred_element_type=jnp.float32)
    o_ref[0] = (acc + b_ref[...].astype(jnp.float32)).astype(o_ref.dtype)


def _flash_attn_kernel(q_ref, k_ref, v_ref, o_ref, m_sc, l_sc, acc_sc, *,
                       heads, dim_head, kv_len):
    # q: (1, H, TQ, d); k/v: (1, H, TKV, d)   [head-major -> whole-slab reads]
    # o: (1, TQ, H*d)                         [lane-dense for to_out]
    # scratch: m/l (H, TQ, 1) f32; acc (H, TQ, d) f32
    kv_idx = pl.program_id(2)
    kv_tile = k_ref.shape[2]

    @pl.when(kv_idx == 0)
    def _():
        m_sc[...] = jnp.full_like(m_sc, -jnp.inf)
        l_sc[...] = jnp.zeros_like(l_sc)
        acc_sc[...] = jnp.zeros_like(acc_sc)

    mask_pad = (kv_len % kv_tile) != 0      # static: trailing KV columns are padding
    if mask_pad:
        col = kv_idx * kv_tile + lax.broadcasted_iota(jnp.int32, (1, kv_tile), 1)
        valid = col < kv_len                # (1, TKV), broadcasts over query rows

    for h in range(heads):
        qh = q_ref[0, h]                    # (TQ, d); softmax scale pre-folded into wq
        kh = k_ref[0, h]                    # (TKV, d)
        vh = v_ref[0, h]
        # s = q @ k^T: contract the last dims, no k transpose relayout.
        s = lax.dot_general(qh, kh, (((1,), (1,)), ((), ())),
                            preferred_element_type=jnp.float32)     # (TQ, TKV) f32
        if mask_pad:
            s = jnp.where(valid, s, _NEG_INF)

        m_prev = m_sc[h]                                            # (TQ, 1)
        m_new = jnp.maximum(m_prev, jnp.max(s, axis=-1, keepdims=True))
        alpha = jnp.exp(m_prev - m_new)                             # (TQ, 1)
        p = jnp.exp(s - m_new)                                      # (TQ, TKV) f32
        l_sc[h] = alpha * l_sc[h] + jnp.sum(p, axis=-1, keepdims=True)
        acc_sc[h] = alpha * acc_sc[h] + jnp.dot(
            p.astype(vh.dtype), vh, preferred_element_type=jnp.float32)
        m_sc[h] = m_new

    @pl.when(kv_idx == pl.num_programs(2) - 1)
    def _():
        for h in range(heads):
            # 1/l folded into the finalize (once per output tile); exact reciprocal
            # keeps the 1e-5 tolerance vs. the reference.
            inv_l = pl.reciprocal(l_sc[h], approx=False)
            o_ref[0, :, h * dim_head:(h + 1) * dim_head] = (
                acc_sc[h] * inv_l).astype(o_ref.dtype)


# --------------------------------------------------------------------------
# Wrappers around pallas_call
# --------------------------------------------------------------------------

def fused_projection(inp, weights, *, heads, dim_head, tm=None):
    """inp: (B, T, Din); weights: tuple of (Din, H*d) matrices sharing one matmul
    (the activation is read from HBM once, the concatenated weight stays resident).
    Each output is HEAD-MAJOR (B, H, T, d)."""
    B, T, Din = inp.shape
    n = len(weights)
    hd = heads * dim_head
    w_cat = jnp.concatenate(list(weights), axis=1) if n > 1 else weights[0]

    tm = _default_proj_tm() if tm is None else tm
    TM = _pick_tile(T, tm, _sublane(inp.dtype))
    grid = (B, T // TM)

    kernel = functools.partial(_proj_kernel, heads=heads, dim_head=dim_head)
    flops = 2 * B * T * Din * n * hd
    bytes_accessed = (inp.size + w_cat.size + n * B * T * hd) * inp.dtype.itemsize

    outs = pl.pallas_call(
        kernel,
        out_shape=tuple(jax.ShapeDtypeStruct((B, heads, T, dim_head), inp.dtype)
                        for _ in range(n)),
        grid_spec=pltpu.PrefetchScalarGridSpec(
            num_scalar_prefetch=0,
            grid=grid,
            in_specs=[
                pl.BlockSpec((1, TM, Din), lambda b, t: (b, t, 0)),
                _resident_spec((Din, n * hd), lambda b, t: (0, 0)),   # weight resident
            ],
            out_specs=tuple(
                pl.BlockSpec((1, heads, TM, dim_head), lambda b, t: (b, 0, t, 0))
                for _ in range(n)),
        ),
        compiler_params=pltpu.CompilerParams(
            dimension_semantics=("parallel", "parallel"),
            vmem_limit_bytes=_vmem_limit_bytes(),
        ),
        cost_estimate=pl.CostEstimate(flops=int(flops), transcendentals=0,
                                      bytes_accessed=int(bytes_accessed)),
    )(inp, w_cat)

    if not isinstance(outs, (tuple, list)):
        outs = (outs,)
    return tuple(outs)


def out_projection(x, w, b, *, tm=None):
    """x: (B, T, H*d) lane-dense; w: (H*d, Dq); b: (Dq,) -> (B, T, Dq)."""
    B, T, HD = x.shape
    Dq = w.shape[1]
    tm = _default_proj_tm() if tm is None else tm
    TM = _pick_tile(T, tm, _sublane(x.dtype))
    grid = (B, T // TM)

    flops = 2 * B * T * HD * Dq
    bytes_accessed = (x.size + w.size + b.size + B * T * Dq) * x.dtype.itemsize

    return pl.pallas_call(
        _out_proj_kernel,
        out_shape=jax.ShapeDtypeStruct((B, T, Dq), x.dtype),
        grid_spec=pltpu.PrefetchScalarGridSpec(
            num_scalar_prefetch=0,
            grid=grid,
            in_specs=[
                pl.BlockSpec((1, TM, HD), lambda bi, t: (bi, t, 0)),
                _resident_spec((HD, Dq), lambda bi, t: (0, 0)),
                _resident_spec((1, Dq), lambda bi, t: (0, 0)),
            ],
            out_specs=pl.BlockSpec((1, TM, Dq), lambda bi, t: (bi, t, 0)),
        ),
        compiler_params=pltpu.CompilerParams(
            dimension_semantics=("parallel", "parallel"),
            vmem_limit_bytes=_vmem_limit_bytes(),
        ),
        cost_estimate=pl.CostEstimate(flops=int(flops), transcendentals=0,
                                      bytes_accessed=int(bytes_accessed)),
    )(x, w, b.reshape(1, -1))


def flash_attention(q, k, v, *, kv_len, tq=256, tkv=512):
    """q: (B, H, N, d); k/v: (B, H, Mp, d) head-major (Mp possibly padded).
    kv_len <= Mp is the number of valid keys (trailing padding is masked).
    Returns (B, N, H*d) lane-dense, ready for to_out."""
    B, H, N, d = q.shape
    Mp = k.shape[2]
    sub = _sublane(q.dtype)
    TQ = _pick_tile(N, tq, sub)
    TKV = _pick_tile(Mp, tkv, sub)    # big KV tile: fewer grid steps / acc rescales
    grid = (B, N // TQ, Mp // TKV)

    kernel = functools.partial(_flash_attn_kernel, heads=H, dim_head=d, kv_len=kv_len)
    flops = 4 * B * H * N * Mp * d            # QK^T and PV matmuls
    transcendentals = B * H * N * Mp          # exp
    bytes_accessed = (2 * q.size + k.size + v.size) * q.dtype.itemsize

    return pl.pallas_call(
        kernel,
        out_shape=jax.ShapeDtypeStruct((B, N, H * d), q.dtype),
        grid_spec=pltpu.PrefetchScalarGridSpec(
            num_scalar_prefetch=0,
            grid=grid,
            in_specs=[
                pl.BlockSpec((1, H, TQ, d), lambda b, qi, ki: (b, 0, qi, 0)),
                pl.BlockSpec((1, H, TKV, d), lambda b, qi, ki: (b, 0, ki, 0)),
                pl.BlockSpec((1, H, TKV, d), lambda b, qi, ki: (b, 0, ki, 0)),
            ],
            out_specs=pl.BlockSpec((1, TQ, H * d), lambda b, qi, ki: (b, qi, 0)),
            scratch_shapes=[
                pltpu.VMEM((H, TQ, 1), jnp.float32),    # running max m
                pltpu.VMEM((H, TQ, 1), jnp.float32),    # running sum l
                pltpu.VMEM((H, TQ, d), jnp.float32),    # output accumulator (head-major)
            ],
        ),
        compiler_params=pltpu.CompilerParams(
            dimension_semantics=("parallel", "parallel", "arbitrary"),
            vmem_limit_bytes=_vmem_limit_bytes(),
        ),
        cost_estimate=pl.CostEstimate(flops=int(flops),
                                      transcendentals=int(transcendentals),
                                      bytes_accessed=int(bytes_accessed)),
    )(q, k, v)


# --------------------------------------------------------------------------
# CrossAttention module (parameters + forward)
# --------------------------------------------------------------------------

def init_cross_attention_params(key, query_dim, context_dim=None, heads=8,
                                dim_head=64, dtype=jnp.float32):
    context_dim = query_dim if context_dim is None else context_dim
    inner_dim = heads * dim_head
    k1, k2, k3, k4 = jax.random.split(key, 4)
    std = 0.02
    # stored already transposed: (in, out), so y = x @ W
    return {
        "wq": (jax.random.normal(k1, (query_dim, inner_dim)) * std).astype(dtype),
        "wk": (jax.random.normal(k2, (context_dim, inner_dim)) * std).astype(dtype),
        "wv": (jax.random.normal(k3, (context_dim, inner_dim)) * std).astype(dtype),
        "wo": (jax.random.normal(k4, (inner_dim, query_dim)) * std).astype(dtype),
        "bo": jnp.zeros((query_dim,), dtype),
        "heads": heads,
        "dim_head": dim_head,
    }


def cross_attention_forward(params, x, context=None):
    """x: [B, N, query_dim]; context: [B, M, context_dim] or None (self-attention)."""
    h = params["heads"]
    d = params["dim_head"]
    scale = float(d) ** (-0.5)
    B, N, _ = x.shape

    is_self = context is None
    if is_self and params["wq"].shape[0] != params["wk"].shape[0]:
        raise ValueError(
            "self-attention (context=None) requires query_dim == context_dim; got "
            f"{params['wq'].shape[0]} vs {params['wk'].shape[0]}")
    ctx = x if is_self else context
    M = ctx.shape[1]

    # Token-dim padding to dtype-aware sublane multiples (e.g. 77-token CLIP context
    # -> 80/128 rows); padded KV columns are masked inside the flash kernel.
    sub = _sublane(x.dtype)
    x_p = _pad_tokens(x, _round_up(N, sub))

    # Softmax scale folded into wq once: removes per-head, per-KV-step multiplies.
    wq_scaled = params["wq"] * scale

    if is_self:
        # x is read from HBM once for all three projections.
        q, k, v = fused_projection(x_p, (wq_scaled, params["wk"], params["wv"]),
                                   heads=h, dim_head=d)
        kv_len = N
    else:
        ctx_p = _pad_tokens(ctx, _round_up(M, sub))
        (q,) = fused_projection(x_p, (wq_scaled,), heads=h, dim_head=d)
        k, v = fused_projection(ctx_p, (params["wk"], params["wv"]),
                                heads=h, dim_head=d)
        kv_len = M

    # q/k/v are head-major (B, H, tokens, d); the attention output is written
    # lane-dense (B, tokens, H*d) -- no HBM transpose passes anywhere.
    out = flash_attention(q, k, v, kv_len=kv_len)
    # to_out: Linear(inner_dim, query_dim) + Dropout(0.0) (identity)
    out = out_projection(out, params["wo"], params["bo"])
    if out.shape[1] != N:          # drop padded query rows, if any
        out = out[:, :N, :]
    return out


# --------------------------------------------------------------------------
# Reference (pure JAX) for correctness check
# --------------------------------------------------------------------------

def reference_forward(params, x, context=None):
    h, d = params["heads"], params["dim_head"]
    scale = float(d) ** (-0.5)
    ctx = x if context is None else context
    B, N, _ = x.shape
    M = ctx.shape[1]
    q = x @ params["wq"]
    k = ctx @ params["wk"]
    v = ctx @ params["wv"]
    q = q.reshape(B, N, h, d).transpose(0, 2, 1, 3)
    k = k.reshape(B, M, h, d).transpose(0, 2, 1, 3)
    v = v.reshape(B, M, h, d).transpose(0, 2, 1, 3)
    sim = jnp.einsum("bhnd,bhmd->bhnm", q, k) * scale
    attn = jax.nn.softmax(sim, axis=-1)
    out = jnp.einsum("bhnm,bhmd->bhnd", attn, v)
    out = out.transpose(0, 2, 1, 3).reshape(B, N, h * d)
    return out @ params["wo"] + params["bo"]


# --------------------------------------------------------------------------
# Main
# --------------------------------------------------------------------------

if __name__ == "__main__":
    key = jax.random.PRNGKey(0)
    kx, kc, kp = jax.random.split(key, 3)

    B, N, query_dim = 2, 16, 32
    M, context_dim = 7, 32        # 7 exercises the pad+mask path (cf. 77-token CLIP ctx)
    heads, dim_head = 4, 8

    params = init_cross_attention_params(
        kp, query_dim, context_dim=context_dim, heads=heads, dim_head=dim_head)

    x = jax.random.normal(kx, (B, N, query_dim), jnp.float32)
    context = jax.random.normal(kc, (B, M, context_dim), jnp.float32)

    # f32: self-attention path (context=None) and cross-attention path (padded+masked KV)
    out_self = cross_attention_forward(params, x, context=None)
    out_cross = cross_attention_forward(params, x, context=context)
    jax.block_until_ready(out_self)
    jax.block_until_ready(out_cross)

    ref_self = reference_forward(params, x, context=None)
    ref_cross = reference_forward(params, x, context=context)

    assert out_self.shape == (B, N, query_dim)
    assert out_cross.shape == (B, N, query_dim)
    assert jnp.allclose(out_self, ref_self, atol=1e-5, rtol=1e-5)
    assert jnp.allclose(out_cross, ref_cross, atol=1e-5, rtol=1e-5)

    # bf16 end-to-end (production dtype): same kernels, f32 softmax stats inside.
    params_bf16 = dict(params)
    for name in ("wq", "wk", "wv", "wo", "bo"):
        params_bf16[name] = params[name].astype(jnp.bfloat16)
    out_bf16 = cross_attention_forward(params_bf16, x.astype(jnp.bfloat16),
                                       context=context.astype(jnp.bfloat16))
    jax.block_until_ready(out_bf16)
    out_bf16_f32 = out_bf16.astype(jnp.float32)
    assert out_bf16.dtype == jnp.bfloat16
    assert out_bf16.shape == (B, N, query_dim)
    assert bool(jnp.all(jnp.isfinite(out_bf16_f32)))
    assert jnp.allclose(out_bf16_f32, ref_cross, atol=5e-2, rtol=5e-2)

    print("KERNEL_OK")
</pallas_src>

<mosaic_0001>
module attributes {stable_mosaic.version = 11 : i64} {
  func.func @_probe(%arg0: i32, %arg1: memref<8x128xf32, #tpu.memory_space<vmem>>, %arg2: memref<8x128xf32, #tpu.memory_space<vmem>>, %arg3: memref<8x128xf32, #tpu.memory_space<vmem>>) attributes {dimension_semantics = [#tpu.dimension_semantics<arbitrary>], iteration_bounds = array<i64: 2>, scalar_prefetch = 0 : i64, scratch_operands = 0 : i64, tpu.core_type = #tpu.core_type<tc>, window_params = [{transform_indices = @transform_0, window_bounds = array<i64: 8, 128>}, {pipeline_mode = #tpu.pipeline_mode<synchronous>, transform_indices = @transform_1, window_bounds = array<i64: 8, 128>}, {transform_indices = @transform_2, window_bounds = array<i64: 8, 128>}]} {
    %c0 = arith.constant 0 : index
    %c0_0 = arith.constant 0 : index
    %0 = vector.load %arg1[%c0, %c0_0] : memref<8x128xf32, #tpu.memory_space<vmem>>, vector<8x128xf32>
    %c0_1 = arith.constant 0 : index
    %c0_2 = arith.constant 0 : index
    %1 = vector.load %arg2[%c0_1, %c0_2] : memref<8x128xf32, #tpu.memory_space<vmem>>, vector<8x128xf32>
    %2 = arith.addf %0, %1 : vector<8x128xf32>
    %c0_3 = arith.constant 0 : index
    %c0_4 = arith.constant 0 : index
    %3 = vector.load %arg3[%c0_3, %c0_4] : memref<8x128xf32, #tpu.memory_space<vmem>>, vector<8x128xf32>
    tpu.vector_store %arg3[%c0_3, %c0_4], %2 {strides = array<i32>} : memref<8x128xf32, #tpu.memory_space<vmem>>, vector<8x128xf32>,
    return
  }
  func.func @transform_0(%arg0: i32) -> (i32, i32) {
    %c0_i32 = arith.constant 0 : i32
    %c0_i32_0 = arith.constant 0 : i32
    return %arg0, %c0_i32 : i32, i32
  }
  func.func @transform_1(%arg0: i32) -> (i32, i32) {
    %c0_i32 = arith.constant 0 : i32
    %c0_i32_0 = arith.constant 0 : i32
    %c0_i32_1 = arith.constant 0 : i32
    return %c0_i32, %c0_i32_0 : i32, i32
  }
  func.func @transform_2(%arg0: i32) -> (i32, i32) {
    %c0_i32 = arith.constant 0 : i32
    %c0_i32_0 = arith.constant 0 : i32
    return %arg0, %c0_i32 : i32, i32
  }
}

module attributes {stable_mosaic.version = 11 : i64} {
  func.func @_proj_kernel(%arg0: i32, %arg1: i32, %arg2: memref<1x16x32xf32, #tpu.memory_space<vmem>>, %arg3: memref<32x96xf32, #tpu.memory_space<vmem>>, %arg4: memref<1x4x16x8xf32, #tpu.memory_space<vmem>>, %arg5: memref<1x4x16x8xf32, #tpu.memory_space<vmem>>, %arg6: memref<1x4x16x8xf32, #tpu.memory_space<vmem>>) attributes {dimension_semantics = [#tpu.dimension_semantics<parallel>, #tpu.dimension_semantics<parallel>], iteration_bounds = array<i64: 2, 1>, scalar_prefetch = 0 : i64, scratch_operands = 0 : i64, tpu.core_type = #tpu.core_type<tc>, window_params = [{transform_indices = @transform_0, window_bounds = array<i64: 1, 16, 32>}, {pipeline_mode = #tpu.pipeline_mode<synchronous>, transform_indices = @transform_1, window_bounds = array<i64: 32, 96>}, {transform_indices = @transform_2, window_bounds = array<i64: 1, 4, 16, 8>}, {transform_indices = @transform_3, window_bounds = array<i64: 1, 4, 16, 8>}, {transform_indices = @transform_4, window_bounds = array<i64: 1, 4, 16, 8>}]} {
    %c0 = arith.constant 0 : index
    %c0_0 = arith.constant 0 : index
    %c0_1 = arith.constant 0 : index
    %0 = vector.load %arg2[%c0, %c0_0, %c0_1] : memref<1x16x32xf32, #tpu.memory_space<vmem>>, vector<1x16x32xf32>
    %1 = vector.shape_cast %0 : vector<1x16x32xf32> to vector<16x32xf32>
    %c0_2 = arith.constant 0 : index
    %c0_3 = arith.constant 0 : index
    %2 = vector.load %arg3[%c0_2, %c0_3] : memref<32x96xf32, #tpu.memory_space<vmem>>, vector<32x32xf32>
    %cst = arith.constant dense<0.000000e+00> : vector<16x32xf32>
    %3 = tpu.matmul %1, %2, %cst {dimension_numbers = #tpu.dot_dimension_numbers<[1], [0], [0], [1], [0, 0, 1, 1], [], []>} : vector<16x32xf32>, vector<32x32xf32>, vector<16x32xf32> -> vector<16x32xf32>
    %4 = vector.extract_strided_slice %3 {offsets = [0, 0], sizes = [16, 8], strides = [1, 1]} : vector<16x32xf32> to vector<16x8xf32>
    %c0_4 = arith.constant 0 : index
    %c0_5 = arith.constant 0 : index
    %c0_6 = arith.constant 0 : index
    %c0_7 = arith.constant 0 : index
    %5 = vector.load %arg4[%c0_4, %c0_5, %c0_6, %c0_7] : memref<1x4x16x8xf32, #tpu.memory_space<vmem>>, vector<1x1x16x8xf32>
    %6 = vector.shape_cast %5 : vector<1x1x16x8xf32> to vector<16x8xf32>
    %7 = vector.shape_cast %4 : vector<16x8xf32> to vector<1x1x16x8xf32>
    tpu.vector_store %arg4[%c0_4, %c0_5, %c0_6, %c0_7], %7 {strides = array<i32>} : memref<1x4x16x8xf32, #tpu.memory_space<vmem>>, vector<1x1x16x8xf32>,
    %8 = vector.extract_strided_slice %3 {offsets = [0, 8], sizes = [16, 8], strides = [1, 1]} : vector<16x32xf32> to vector<16x8xf32>
    %c0_8 = arith.constant 0 : index
    %c1 = arith.constant 1 : index
    %c0_9 = arith.constant 0 : index
    %c0_10 = arith.constant 0 : index
    %9 = vector.load %arg4[%c0_8, %c1, %c0_9, %c0_10] : memref<1x4x16x8xf32, #tpu.memory_space<vmem>>, vector<1x1x16x8xf32>
    %10 = vector.shape_cast %9 : vector<1x1x16x8xf32> to vector<16x8xf32>
    %11 = vector.shape_cast %8 : vector<16x8xf32> to vector<1x1x16x8xf32>
    tpu.vector_store %arg4[%c0_8, %c1, %c0_9, %c0_10], %11 {strides = array<i32>} : memref<1x4x16x8xf32, #tpu.memory_space<vmem>>, vector<1x1x16x8xf32>,
    %12 = vector.extract_strided_slice %3 {offsets = [0, 16], sizes = [16, 8], strides = [1, 1]} : vector<16x32xf32> to vector<16x8xf32>
    %c0_11 = arith.constant 0 : index
    %c2 = arith.constant 2 : index
    %c0_12 = arith.constant 0 : index
    %c0_13 = arith.constant 0 : index
    %13 = vector.load %arg4[%c0_11, %c2, %c0_12, %c0_13] : memref<1x4x16x8xf32, #tpu.memory_space<vmem>>, vector<1x1x16x8xf32>
    %14 = vector.shape_cast %13 : vector<1x1x16x8xf32> to vector<16x8xf32>
    %15 = vector.shape_cast %12 : vector<16x8xf32> to vector<1x1x16x8xf32>
    tpu.vector_store %arg4[%c0_11, %c2, %c0_12, %c0_13], %15 {strides = array<i32>} : memref<1x4x16x8xf32, #tpu.memory_space<vmem>>, vector<1x1x16x8xf32>,
    %16 = vector.extract_strided_slice %3 {offsets = [0, 24], sizes = [16, 8], strides = [1, 1]} : vector<16x32xf32> to vector<16x8xf32>
    %c0_14 = arith.constant 0 : index
    %c3 = arith.constant 3 : index
    %c0_15 = arith.constant 0 : index
    %c0_16 = arith.constant 0 : index
    %17 = vector.load %arg4[%c0_14, %c3, %c0_15, %c0_16] : memref<1x4x16x8xf32, #tpu.memory_space<vmem>>, vector<1x1x16x8xf32>
    %18 = vector.shape_cast %17 : vector<1x1x16x8xf32> to vector<16x8xf32>
    %19 = vector.shape_cast %16 : vector<16x8xf32> to vector<1x1x16x8xf32>
    tpu.vector_store %arg4[%c0_14, %c3, %c0_15, %c0_16], %19 {strides = array<i32>} : memref<1x4x16x8xf32, #tpu.memory_space<vmem>>, vector<1x1x16x8xf32>,
    %c0_17 = arith.constant 0 : index
    %c32 = arith.constant 32 : index
    %20 = vector.load %arg3[%c0_17, %c32] : memref<32x96xf32, #tpu.memory_space<vmem>>, vector<32x32xf32>
    %cst_18 = arith.constant dense<0.000000e+00> : vector<16x32xf32>
    %21 = tpu.matmul %1, %20, %cst_18 {dimension_numbers = #tpu.dot_dimension_numbers<[1], [0], [0], [1], [0, 0, 1, 1], [], []>} : vector<16x32xf32>, vector<32x32xf32>, vector<16x32xf32> -> vector<16x32xf32>
    %22 = vector.extract_strided_slice %21 {offsets = [0, 0], sizes = [16, 8], strides = [1, 1]} : vector<16x32xf32> to vector<16x8xf32>
    %c0_19 = arith.constant 0 : index
    %c0_20 = arith.constant 0 : index
    %c0_21 = arith.constant 0 : index
    %c0_22 = arith.constant 0 : index
    %23 = vector.load %arg5[%c0_19, %c0_20, %c0_21, %c0_22] : memref<1x4x16x8xf32, #tpu.memory_space<vmem>>, vector<1x1x16x8xf32>
    %24 = vector.shape_cast %23 : vector<1x1x16x8xf32> to vector<16x8xf32>
    %25 = vector.shape_cast %22 : vector<16x8xf32> to vector<1x1x16x8xf32>
    tpu.vector_store %arg5[%c0_19, %c0_20, %c0_21, %c0_22], %25 {strides = array<i32>} : memref<1x4x16x8xf32, #tpu.memory_space<vmem>>, vector<1x1x16x8xf32>,
    %26 = vector.extract_strided_slice %21 {offsets = [0, 8], sizes = [16, 8], strides = [1, 1]} : vector<16x32xf32> to vector<16x8xf32>
    %c0_23 = arith.constant 0 : index
    %c1_24 = arith.constant 1 : index
    %c0_25 = arith.constant 0 : index
    %c0_26 = arith.constant 0 : index
    %27 = vector.load %arg5[%c0_23, %c1_24, %c0_25, %c0_26] : memref<1x4x16x8xf32, #tpu.memory_space<vmem>>, vector<1x1x16x8xf32>
    %28 = vector.shape_cast %27 : vector<1x1x16x8xf32> to vector<16x8xf32>
    %29 = vector.shape_cast %26 : vector<16x8xf32> to vector<1x1x16x8xf32>
    tpu.vector_store %arg5[%c0_23, %c1_24, %c0_25, %c0_26], %29 {strides = array<i32>} : memref<1x4x16x8xf32, #tpu.memory_space<vmem>>, vector<1x1x16x8xf32>,
    %30 = vector.extract_strided_slice %21 {offsets = [0, 16], sizes = [16, 8], strides = [1, 1]} : vector<16x32xf32> to vector<16x8xf32>
    %c0_27 = arith.constant 0 : index
    %c2_28 = arith.constant 2 : index
    %c0_29 = arith.constant 0 : index
    %c0_30 = arith.constant 0 : index
    %31 = vector.load %arg5[%c0_27, %c2_28, %c0_29, %c0_30] : memref<1x4x16x8xf32, #tpu.memory_space<vmem>>, vector<1x1x16x8xf32>
    %32 = vector.shape_cast %31 : vector<1x1x16x8xf32> to vector<16x8xf32>
    %33 = vector.shape_cast %30 : vector<16x8xf32> to vector<1x1x16x8xf32>
    tpu.vector_store %arg5[%c0_27, %c2_28, %c0_29, %c0_30], %33 {strides = array<i32>} : memref<1x4x16x8xf32, #tpu.memory_space<vmem>>, vector<1x1x16x8xf32>,
    %34 = vector.extract_strided_slice %21 {offsets = [0, 24], sizes = [16, 8], strides = [1, 1]} : vector<16x32xf32> to vector<16x8xf32>
    %c0_31 = arith.constant 0 : index
    %c3_32 = arith.constant 3 : index
    %c0_33 = arith.constant 0 : index
    %c0_34 = arith.constant 0 : index
    %35 = vector.load %arg5[%c0_31, %c3_32, %c0_33, %c0_34] : memref<1x4x16x8xf32, #tpu.memory_space<vmem>>, vector<1x1x16x8xf32>
    %36 = vector.shape_cast %35 : vector<1x1x16x8xf32> to vector<16x8xf32>
    %37 = vector.shape_cast %34 : vector<16x8xf32> to vector<1x1x16x8xf32>
    tpu.vector_store %arg5[%c0_31, %c3_32, %c0_33, %c0_34], %37 {strides = array<i32>} : memref<1x4x16x8xf32, #tpu.memory_space<vmem>>, vector<1x1x16x8xf32>,
    %c0_35 = arith.constant 0 : index
    %c64 = arith.constant 64 : index
    %38 = vector.load %arg3[%c0_35, %c64] : memref<32x96xf32, #tpu.memory_space<vmem>>, vector<32x32xf32>
    %cst_36 = arith.constant dense<0.000000e+00> : vector<16x32xf32>
    %39 = tpu.matmul %1, %38, %cst_36 {dimension_numbers = #tpu.dot_dimension_numbers<[1], [0], [0], [1], [0, 0, 1, 1], [], []>} : vector<16x32xf32>, vector<32x32xf32>, vector<16x32xf32> -> vector<16x32xf32>
    %40 = vector.extract_strided_slice %39 {offsets = [0, 0], sizes = [16, 8], strides = [1, 1]} : vector<16x32xf32> to vector<16x8xf32>
    %c0_37 = arith.constant 0 : index
    %c0_38 = arith.constant 0 : index
    %c0_39 = arith.constant 0 : index
    %c0_40 = arith.constant 0 : index
    %41 = vector.load %arg6[%c0_37, %c0_38, %c0_39, %c0_40] : memref<1x4x16x8xf32, #tpu.memory_space<vmem>>, vector<1x1x16x8xf32>
    %42 = vector.shape_cast %41 : vector<1x1x16x8xf32> to vector<16x8xf32>
    %43 = vector.shape_cast %40 : vector<16x8xf32> to vector<1x1x16x8xf32>
    tpu.vector_store %arg6[%c0_37, %c0_38, %c0_39, %c0_40], %43 {strides = array<i32>} : memref<1x4x16x8xf32, #tpu.memory_space<vmem>>, vector<1x1x16x8xf32>,
    %44 = vector.extract_strided_slice %39 {offsets = [0, 8], sizes = [16, 8], strides = [1, 1]} : vector<16x32xf32> to vector<16x8xf32>
    %c0_41 = arith.constant 0 : index
    %c1_42 = arith.constant 1 : index
    %c0_43 = arith.constant 0 : index
    %c0_44 = arith.constant 0 : index
    %45 = vector.load %arg6[%c0_41, %c1_42, %c0_43, %c0_44] : memref<1x4x16x8xf32, #tpu.memory_space<vmem>>, vector<1x1x16x8xf32>
    %46 = vector.shape_cast %45 : vector<1x1x16x8xf32> to vector<16x8xf32>
    %47 = vector.shape_cast %44 : vector<16x8xf32> to vector<1x1x16x8xf32>
    tpu.vector_store %arg6[%c0_41, %c1_42, %c0_43, %c0_44], %47 {strides = array<i32>} : memref<1x4x16x8xf32, #tpu.memory_space<vmem>>, vector<1x1x16x8xf32>,
    %48 = vector.extract_strided_slice %39 {offsets = [0, 16], sizes = [16, 8], strides = [1, 1]} : vector<16x32xf32> to vector<16x8xf32>
    %c0_45 = arith.constant 0 : index
    %c2_46 = arith.constant 2 : index
    %c0_47 = arith.constant 0 : index
    %c0_48 = arith.constant 0 : index
    %49 = vector.load %arg6[%c0_45, %c2_46, %c0_47, %c0_48] : memref<1x4x16x8xf32, #tpu.memory_space<vmem>>, vector<1x1x16x8xf32>
    %50 = vector.shape_cast %49 : vector<1x1x16x8xf32> to vector<16x8xf32>
    %51 = vector.shape_cast %48 : vector<16x8xf32> to vector<1x1x16x8xf32>
    tpu.vector_store %arg6[%c0_45, %c2_46, %c0_47, %c0_48], %51 {strides = array<i32>} : memref<1x4x16x8xf32, #tpu.memory_space<vmem>>, vector<1x1x16x8xf32>,
    %52 = vector.extract_strided_slice %39 {offsets = [0, 24], sizes = [16, 8], strides = [1, 1]} : vector<16x32xf32> to vector<16x8xf32>
    %c0_49 = arith.constant 0 : index
    %c3_50 = arith.constant 3 : index
    %c0_51 = arith.constant 0 : index
    %c0_52 = arith.constant 0 : index
    %53 = vector.load %arg6[%c0_49, %c3_50, %c0_51, %c0_52] : memref<1x4x16x8xf32, #tpu.memory_space<vmem>>, vector<1x1x16x8xf32>
    %54 = vector.shape_cast %53 : vector<1x1x16x8xf32> to vector<16x8xf32>
    %55 = vector.shape_cast %52 : vector<16x8xf32> to vector<1x1x16x8xf32>
    tpu.vector_store %arg6[%c0_49, %c3_50, %c0_51, %c0_52], %55 {strides = array<i32>} : memref<1x4x16x8xf32, #tpu.memory_space<vmem>>, vector<1x1x16x8xf32>,
    return
  }
  func.func @transform_0(%arg0: i32, %arg1: i32) -> (i32, i32, i32) {
    %c0_i32 = arith.constant 0 : i32
    %c0_i32_0 = arith.constant 0 : i32
    return %arg0, %arg1, %c0_i32 : i32, i32, i32
  }
  func.func @transform_1(%arg0: i32, %arg1: i32) -> (i32, i32) {
    %c0_i32 = arith.constant 0 : i32
    %c0_i32_0 = arith.constant 0 : i32
    %c0_i32_1 = arith.constant 0 : i32
    return %c0_i32, %c0_i32_0 : i32, i32
  }
  func.func @transform_2(%arg0: i32, %arg1: i32) -> (i32, i32, i32, i32) {
    %c0_i32 = arith.constant 0 : i32
    %c0_i32_0 = arith.constant 0 : i32
    %c0_i32_1 = arith.constant 0 : i32
    return %arg0, %c0_i32, %arg1, %c0_i32_0 : i32, i32, i32, i32
  }
  func.func @transform_3(%arg0: i32, %arg1: i32) -> (i32, i32, i32, i32) {
    %c0_i32 = arith.constant 0 : i32
    %c0_i32_0 = arith.constant 0 : i32
    %c0_i32_1 = arith.constant 0 : i32
    return %arg0, %c0_i32, %arg1, %c0_i32_0 : i32, i32, i32, i32
  }
  func.func @transform_4(%arg0: i32, %arg1: i32) -> (i32, i32, i32, i32) {
    %c0_i32 = arith.constant 0 : i32
    %c0_i32_0 = arith.constant 0 : i32
    %c0_i32_1 = arith.constant 0 : i32
    return %arg0, %c0_i32, %arg1, %c0_i32_0 : i32, i32, i32, i32
  }
}

</mosaic_0001>

<bundles_post_ra>
// kernel: tpu_custom_call.1
= control target key start
LH: loop header
LB: loop body
LE: loop exit
PB: predicated region body
PF: predicated region fallthrough
CT: control target
= control target key end

     0   :  { %7 = vsyncpa [#allocation3], 0  ;;  %s649_s0 = inlined_call_operand.hbm [shape: f32[16,128], index: 0, kind: input, shape index: {}]   ;;  %s650_s1 = inlined_call_operand.hbm [shape: f32[8,128], index: 1, kind: input, shape index: {}]   ;;  %s651_s2 = inlined_call_operand.hbm [shape: f32[16,128], index: 2, kind: output, shape index: {}]  }
   0x1   :  { %9 = vsyncpa [#allocation3 + $0x1], 0 }
   0x2   :  { %10 = vsyncpa [#allocation6], 0 }
   0x3   :  { %11 = vsyncpa [#allocation4], 0 }
   0x4   :  { %13 = vsyncpa [#allocation4 + $0x1], 0  ;;  %s483_s9 = smov 0   ;;  %s485_s10 = smov 0  }
   0x5   :  { %s487_s11 = smov 0   ;;  %s489_s12 = smov 0  }
   0x6 LB: > { %s504_s13 = sadd.s32 4294967295, %s463_s12   ;;  %s270_s14 = sadd.s32 4294967294, %s463_s12   ;;  %s463_s12 = sphi %s489_s12, %s674_s12   ;;  %s459_s11 = sphi %s487_s11, %s673_s11   ;;  %s455_s10 = sphi %s485_s10, %s672_s10   ;;  %s451_s9 = sphi %s483_s9, %s671_s9  }
   0x7   : > { %p39_p0 = scmp.ne.s32.totalorder %s455_s10, %s451_s9  ;;  %p652_p1 = scmp.eq.s32.totalorder %s504_s13, 0 }
   0x8   : > { %p90_p3 = scmp.eq.s32.totalorder %s270_s14, 1  ;;  %p271_p5 = scmp.ge.s32.totalorder %s463_s12, 1 }
   0x9   : > { %p513_p4 = por %p652_p1, %p39_p0  ;;  %p97_p7 = scmp.lt.s32.totalorder %s463_s12, 3 }
   0xa   : > { %p518_p6 = por %p90_p3, %p39_p0  ;;  %s465_s18 = smov [#allocation5]  }
   0xb   : > { %s656_s15 = scalar_select %p513_p4, 1, 0 }
   0xc   : > { %s657_s16 = scalar_select %p518_p6, 1, 0 }
   0xd   : > { %p523_p8 = pnand %p271_p5, %p97_p7  ;;  %s110_s19 = sshll.u32 %s465_s18, 4  ;;  %s111_s19 = int_to_ptr.vmem [resolvable:$true] %s110_s19 }
   0xe   : > { %s531_s20 = sadd.s32 1, %s463_s12   ;;  %s26_s24 = sadd.s32 1, %s459_s11 }
   0xf   : > { %s658_s17 = scalar_select %p523_p8, 1, 0 }
  0x10   : > { %p292_p10 = pneg %p523_p8  ;;  %s23_s22 = ssub.s32 %s463_s12, %s531_s20 }
  0x11   : > { %p541_p12 = scmp.eq.s32.totalorder %s23_s22, 0  ;;  %p33_p13 = scmp.ne.s32.totalorder %s459_s11, %s455_s10 }
  0x12   : > { %p535_p11 = pnand %p292_p10, %p652_p1  ;;  %s352_s25 = scalar_lea.vmem %s111_s19, 128 }
  0x13   : > { %p353_p3 = scmp.ne.s32.totalorder %s111_s19, %s352_s25  ;;  %p360_p9 = scmp.lt.s32.totalorder %s111_s19, %s111_s19 }
  0x14   : > { %p343_p0 = pneg %p535_p11  ;;  %p361_p2 = scmp.lt.s32.totalorder %s352_s25, %s352_s25 }
  0x16   : > { %p355_p5 = pnand %p353_p3, %p343_p0  ;;  %p362_p10 = por %p361_p2, %p360_p9 }
  0x18   : > { %p356_p7 = pneg %p355_p5 }
  0x1a   : > { %p363_p1 = pnand %p362_p10, %p356_p7 }
  0x1c   : > { %366 = shalt.err (!%p363_p1)
}
  0x1d   : > { %295 = dma.hbm_to_vmem [thread:$0]  (!%p535_p11), %s650_s1, 128, %s111_s19, [#allocation6]  }
  0x1e   : > { %s558_s28 = scalar_select %p541_p12, %s459_s11, %s26_s24  }
  0x1f   : > { %p34_p1 = scmp.eq.s32.totalorder %s463_s12, 0  ;;  %p661_p2 = scmp.eq.s32.totalorder %s504_s13, 1 }
  0x20   : > { %p305_p0 = scmp.lt.s32.totalorder %s463_s12, 2  ;;  %s121_s30 = sand.u32 1, %s459_s11  }
  0x21   : > { %p566_p9 = por %p661_p2, %p33_p13  ;;  %p35_p3 = por %p34_p1, %p33_p13 }
  0x22   : > { %s274_s3 = sshll.u32 %s121_s30, 3  ;;  %s275_s4 = sshll.u32 %s463_s12, 7 }
  0x23   : > { %s662_s29 = scalar_select %p566_p9, 1, 0 }
  0x24   : > { %s579_s7 = scalar_lea.hbm %s649_s0, %s275_s4  ;;  %s125_s8 = scalar_lea.vmem [#allocation2], %s274_s3 }
  0x25   : > { %s132_s14 = sshll.u32 %s125_s8, 4  ;;  %p581_p11 = pnand %p305_p0, %p35_p3  ;;  %s133_s14 = int_to_ptr.vmem [resolvable:$true] %s132_s14 }
  0x26   : > { %s122_s19 = scalar_lea.sflag [#allocation3], %s121_s30  ;;  %s367_s21 = scalar_lea.hbm %s579_s7, 128 }
  0x27   : > { %p368_p12 = scmp.ne.s32.totalorder %s579_s7, %s367_s21  ;;  %p369_p13 = pneg %p581_p11 }
  0x28   : > { %s372_s24 = scalar_lea.hbm %s649_s0, 256  ;;  %p373_p10 = scmp.lt.s32.totalorder %s579_s7, %s649_s0 }
  0x29   : > { %p370_p5 = pnand %p369_p13, %p368_p12  ;;  %p374_p1 = scmp.lt.s32.totalorder %s372_s24, %s367_s21 }
  0x2b   : > { %p371_p7 = pneg %p370_p5  ;;  %p375_p2 = por %p374_p1, %p373_p10 }
  0x2d   : > { %p376_p0 = pnand %p375_p2, %p371_p7 }
  0x2f   : > { %379 = shalt.err (!%p376_p0)
}
  0x30   : > { %s380_s27 = scalar_lea.vmem %s133_s14, 128  ;;  %s466_s30 = smov [#allocation2]  }
  0x31   : > { %p381_p3 = scmp.ne.s32.totalorder %s133_s14, %s380_s27  ;;  %s385_s3 = sshll.u32 %s466_s30, 4  ;;  %s386_s3 = int_to_ptr.vmem [resolvable:$false] %s385_s3 }
  0x32   : > { %s387_s4 = scalar_lea.vmem %s386_s3, 256  ;;  %p388_p12 = scmp.lt.s32.totalorder %s133_s14, %s386_s3 }
  0x33   : > { %p383_p6 = pnand %p381_p3, %p369_p13  ;;  %p389_p5 = scmp.lt.s32.totalorder %s387_s4, %s380_s27 }
  0x35   : > { %p384_p9 = pneg %p383_p6  ;;  %p390_p4 = por %p389_p5, %p388_p12 }
  0x37   : > { %p391_p8 = pnand %p390_p4, %p384_p9 }
  0x39   : > { %394 = shalt.err (!%p391_p8)
}
  0x3a   : > { %299 = dma.hbm_to_vmem [thread:$0]  (!%p581_p11), %s579_s7, 128, %s133_s14, %s122_s19  }
  0x3b   : > { %p664_p7 = scmp.ne.s32.totalorder %s658_s17, 0 }
  0x3c   : > { %s602_s5 = sand.u32 (!%p664_p7), 1, %s455_s10   ;;  %p665_p6 = scmp.ne.s32.totalorder (!%p664_p7), %s656_s15, 0 }
  0x3d   : > { %141 = sbr.rel (%p664_p7) target bundleno = 95 (0x5f), region = 28  ;;  %s277_s6 = sshll.u32 (!%p664_p7), %s602_s5, 3 }
  0x3e   : > { %s144_s8 = scalar_lea.sflag (!%p664_p7), [#allocation3], %s602_s5  ;;  %s147_s21 = scalar_lea.vmem (!%p664_p7), [#allocation2], %s277_s6 }
  0x42   : > { %438 = dma.done.wait (%p665_p6), %s144_s8, 128  }
  0x43   : > { %440 = vsyncadd (%p665_p6), %s144_s8, 4294967168  ;;  %p666_p4 = scmp.eq.s32.totalorder %s504_s13, 0 }
  0x45   : > { %442 = dma.done.wait (%p666_p4), [#allocation6], 128   ;;  %p667_p8 = pmov %p666_p4 }
  0x46   : > { %s171_s17 = scalar_lea.vmem [#allocation7], %s277_s6  ;;  %s281_s14 = sshll.u32 %s504_s13, 7  ;;  %v172_v0 = vld [vmem:[%s147_s21] sm:$0xff]  ;;  %v173_v1 = vld [vmem:[#allocation5] sm:$0xff] }
  0x47   : > { %444 = vsyncadd (%p667_p8), [#allocation6], 4294967168  ;;  %s190_s7 = sshll.u32 %s171_s17, 4  ;;  %v174_v2 = vadd.f32 %v173_v1, %v172_v0  ;;  %s188_s15 = scalar_lea.hbm %s651_s2, %s281_s14  ;;  %s191_s7 = int_to_ptr.vmem [resolvable:$true] %s190_s7 }
  0x48   : > { %s177_s22 = scalar_lea.sflag [#allocation4], %s602_s5  ;;  %s395_s23 = scalar_lea.vmem %s191_s7, 128 }
  0x49   : > { %175 = vst [vmem:[%s171_s17] sm:$0xff] %v174_v2  ;;  %p396_p9 = scmp.ne.s32.totalorder %s191_s7, %s395_s23  ;;  %p668_p11 = scmp.ne.s32.totalorder %s662_s29, 0 }
  0x4a   : > { %s467_s24 = smov [#allocation7]  }
  0x4b   : > { %p397_p13 = pnand %p396_p9, %p668_p11  ;;  %s399_s25 = sshll.u32 %s467_s24, 4  ;;  %s400_s25 = int_to_ptr.vmem [resolvable:$false] %s399_s25 }
  0x4c   : > { %s401_s26 = scalar_lea.vmem %s400_s25, 256  ;;  %p402_p1 = scmp.lt.s32.totalorder %s191_s7, %s400_s25 }
  0x4d   : > { %p398_p10 = pneg %p397_p13  ;;  %p403_p2 = scmp.lt.s32.totalorder %s401_s26, %s395_s23 }
  0x4f   : > { %p404_p0 = por %p403_p2, %p402_p1 }
  0x51   : > { %p405_p3 = pnand %p404_p0, %p398_p10 }
  0x53   : > { %408 = shalt.err (!%p405_p3)
}
  0x54   : > { %s409_s13 = scalar_lea.hbm %s188_s15, 128  ;;  %s413_s3 = scalar_lea.hbm %s651_s2, 256 }
  0x55   : > { %p410_p12 = scmp.ne.s32.totalorder %s188_s15, %s409_s13  ;;  %p414_p6 = scmp.lt.s32.totalorder %s188_s15, %s651_s2 }
  0x56   : > { %p415_p4 = scmp.lt.s32.totalorder %s413_s3, %s409_s13 }
  0x57   : > { %p411_p5 = pnand %p410_p12, %p668_p11 }
  0x58   : > { %p416_p8 = por %p415_p4, %p414_p6 }
  0x59   : > { %p412_p7 = pneg %p411_p5 }
  0x5b   : > { %p417_p9 = pnand %p416_p8, %p412_p7 }
  0x5d   : > { %420 = shalt.err (!%p417_p9)
}
  0x5e   : > { %290 = dma.vmem_to_hbm [thread:$0]  (%p668_p11), %s191_s7, 128, %s188_s15, %s177_s22  }
  0x5f PF: > { %s202_s6 = sand.u32 1, %s451_s9   ;;  %p669_p13 = scmp.ne.s32.totalorder %s657_s16, 0 }
  0x60   : > { %p670_p10 = scmp.ge.s32.totalorder %s463_s12, 2  ;;  %s203_s8 = scalar_lea.sflag [#allocation4], %s202_s6 }
  0x62   : > { %p301_p1 = pnand %p670_p10, %p669_p13 }
  0x64   : > { %p302_p2 = pneg %p301_p1 }
  0x66   : > { %446 = dma.done.wait (%p302_p2), %s203_s8, 128  }
  0x67   : > { %448 = vsyncadd (%p302_p2), %s203_s8, 4294967168  ;;  %p16_p0 = scmp.ge.s32.totalorder %s531_s20, 4   ;;  %s671_s9 = smov %s455_s10 }
  0x68   : > { %s672_s10 = smov %s459_s11  ;;  %s673_s11 = smov %s558_s28 }
  0x69   : > { %s674_s12 = smov %s531_s20  ;;  %18 = sbr.rel (!%p16_p0) target bundleno = 6 (0x6), region = 77 }
  0x6e   :  { %208 = vsyncpa [#allocation3], 1 }
  0x6f   :  { %210 = vsyncpa [#allocation3 + $0x1], 1 }
  0x70   :  { %211 = vsyncpa [#allocation6], 1 }
  0x71   :  { %212 = vsyncpa [#allocation4], 1 }
  0x72   :  { %214 = vsyncpa [#allocation4 + $0x1], 1 }

// kernel: tpu_custom_call.1
= control target key start
LH: loop header
LB: loop body
LE: loop exit
PB: predicated region body
PF: predicated region fallthrough
CT: control target
= control target key end

     0   :  { %10 = vsyncpa [#allocation3], 0  ;;  %s1414_s0 = inlined_call_operand.hbm [shape: f32[2,16,32], index: 0, kind: input, shape index: {}]   ;;  %s1415_s1 = inlined_call_operand.hbm [shape: f32[32,96], index: 1, kind: input, shape index: {}]   ;;  %s1416_s2 = inlined_call_operand.vmem [shape: f32[2,4,16,8], index: 2, kind: output, shape index: {0}]   ;;  %s1417_s3 = inlined_call_operand.vmem [shape: f32[2,4,16,8], index: 3, kind: output, shape index: {1}]   ;;  %s1418_s4 = inlined_call_operand.vmem [shape: f32[2,4,16,8], index: 4, kind: output, shape index: {2}]  }
   0x1   :  { %12 = vsyncpa [#allocation3 + $0x1], 0 }
   0x2   :  { %13 = vsyncpa [#allocation5], 0  ;;  %s1200_s15 = smov 0   ;;  %s1202_s16 = smov 0  }
   0x3   :  { %s1204_s17 = smov 0   ;;  %s1206_s18 = smov 0  }
   0x4   :  { %s1208_s19 = smov 0   ;;  %s1210_s20 = smov 0  }
   0x5 LB: > { %s885_s21 = sadd.s32 4294967295, %s1164_s20   ;;  %p53_p0 = scmp.ne.s32.totalorder %s1148_s16, %s1144_s15  ;;  %s1164_s20 = sphi %s1210_s20, %s19_s20   ;;  %s1160_s19 = sphi %s1208_s19, %s1428_s19   ;;  %s1156_s18 = sphi %s1206_s18, %s1427_s18   ;;  %s1152_s17 = sphi %s1204_s17, %s1426_s17   ;;  %s1148_s16 = sphi %s1202_s16, %s1425_s16   ;;  %s1144_s15 = sphi %s1200_s15, %s1424_s15  }
   0x6   : > { %p1230_p1 = scmp.eq.s32.totalorder %s885_s21, 0  ;;  %p887_p2 = scmp.ge.s32.totalorder %s1164_s20, 1 }
   0x7   : > { %p169_p3 = scmp.lt.s32.totalorder %s1164_s20, 3  ;;  %s1166_s25 = smov [#allocation4]  }
   0x8   : > { %p1238_p4 = por %p1230_p1, %p53_p0  ;;  %s181_s26 = sshll.u32 %s1166_s25, 4  ;;  %s182_s26 = int_to_ptr.vmem [resolvable:$true] %s181_s26 }
   0x9   : > { %p1242_p5 = pnand %p887_p2, %p169_p3  ;;  %s31_s28 = sadd.s32 1, %s1160_s19 }
   0xa   : > { %s1067_s29 = scalar_lea.vmem %s182_s26, 512  ;;  %p1075_p12 = scmp.lt.s32.totalorder %s182_s26, %s182_s26 }
   0xb   : > { %p989_p6 = pneg %p1242_p5  ;;  %p1068_p9 = scmp.ne.s32.totalorder %s182_s26, %s1067_s29 }
   0xc   : > { %p1076_p13 = scmp.lt.s32.totalorder %s1067_s29, %s1067_s29 }
   0xd   : > { %p1250_p7 = pnand %p989_p6, %p1230_p1 }
   0xe   : > { %p1077_p0 = por %p1076_p13, %p1075_p12 }
   0xf   : > { %p1058_p8 = pneg %p1250_p7 }
  0x11   : > { %p1070_p10 = pnand %p1068_p9, %p1058_p8 }
  0x13   : > { %p1071_p11 = pneg %p1070_p10 }
  0x15   : > { %p1078_p2 = pnand %p1077_p0, %p1071_p11 }
  0x17   : > { %1081 = shalt.err (!%p1078_p2)
}
  0x18   : > { %s1167_s30 = smov 128   ;;  %s1168_s5 = smov 8  }
  0x19   : > { %992 = dma.hbm_to_vmem [thread:$0]  (!%p1250_p7), %s1415_s1, 512, %s182_s26, [#allocation5], %s1167_s30, %s1167_s30, %s1168_s5  }
  0x1a   : > { %p33_p3 = scmp.ge.s32.totalorder %s31_s28, 2  ;;  %s40_s8 = sadd.s32 1, %s1152_s17 }
  0x1b   : > { %p47_p6 = scmp.ne.s32.totalorder %s1152_s17, %s1148_s16  ;;  %p48_p8 = scmp.eq.s32.totalorder %s1164_s20, 0 }
  0x1c   : > { %s1430_s28 = smov (%p33_p3, %s31_s28), 0  ;;  %p998_p10 = scmp.lt.s32.totalorder %s1164_s20, 2 }
  0x1d   : > { %p49_p9 = por %p48_p8, %p47_p6  ;;  %s35_s9 = ssub.s32 %s1160_s19, %s1430_s28 }
  0x1e   : > { %s195_s10 = sand.u32 1, %s1152_s17   ;;  %p38_p11 = scmp.eq.s32.totalorder %s35_s9, 0 }
  0x1f   : > { %s890_s11 = sshll.u32 %s195_s10, 4  ;;  %s928_s12 = sshll.u32 %s1160_s19, 8 }
  0x20   : > { %s1277_s13 = scalar_select %p38_p11, %s1152_s17, %s40_s8  }
  0x21   : > { %s207_s21 = scalar_lea.hbm %s1414_s0, %s928_s12  ;;  %s199_s25 = scalar_lea.vmem [#allocation2], %s890_s11 }
  0x22   : > { %s208_s26 = sshll.u32 %s199_s25, 4  ;;  %p1282_p7 = pnand %p998_p10, %p49_p9  ;;  %s209_s26 = int_to_ptr.vmem [resolvable:$true] %s208_s26 }
  0x23   : > { %s196_s29 = scalar_lea.sflag [#allocation3], %s195_s10  ;;  %s1095_s6 = scalar_lea.vmem %s209_s26, 256 }
  0x24   : > { %p1084_p12 = pneg %p1282_p7  ;;  %p1096_p13 = scmp.ne.s32.totalorder %s209_s26, %s1095_s6 }
  0x25   : > { %s1169_s7 = smov [#allocation2]  }
  0x26   : > { %p1098_p0 = pnand %p1096_p13, %p1084_p12  ;;  %s1100_s8 = sshll.u32 %s1169_s7, 4  ;;  %s1101_s8 = int_to_ptr.vmem [resolvable:$false] %s1100_s8 }
  0x27   : > { %s1102_s9 = scalar_lea.vmem %s1101_s8, 512  ;;  %p1103_p3 = scmp.lt.s32.totalorder %s209_s26, %s1101_s8 }
  0x28   : > { %p1099_p2 = pneg %p1098_p0  ;;  %p1104_p6 = scmp.lt.s32.totalorder %s1102_s9, %s1095_s6 }
  0x2a   : > { %p1105_p8 = por %p1104_p6, %p1103_p3 }
  0x2c   : > { %p1106_p9 = pnand %p1105_p8, %p1099_p2 }
  0x2e   : > { %1109 = shalt.err (!%p1106_p9)
}
  0x2f   : > { %996 = dma.hbm_to_vmem [thread:$0]  (!%p1282_p7), %s207_s21, 256, %s209_s26, %s196_s29, %s1167_s30, %s1167_s30, %s1168_s5  }
  0x30   : > { %220 = sbr.rel (%p1242_p5) target bundleno = 517 (0x205), region = 28  ;;  %s222_s10 = sand.u32 (!%p1242_p5), 1, %s1148_s16  }
  0x31   : > { %s1296_s11 = sshll.u32 (!%p1242_p5), %s222_s10, 4  ;;  %s223_s12 = scalar_lea.sflag (!%p1242_p5), [#allocation3], %s222_s10 }
  0x32   : > { %s226_s14 = scalar_lea.vmem (!%p1242_p5), [#allocation2], %s1296_s11 }
  0x35   : > { %1135 = dma.done.wait (%p1238_p4), %s223_s12, 256  }
  0x36   : > { %1137 = vsyncadd (%p1238_p4), %s223_s12, 4294967040 }
  0x37   : > { %1139 = dma.done.wait (%p1230_p1), [#allocation5], 512  }
  0x38   : > { %1141 = vsyncadd (%p1230_p1), [#allocation5], 4294966784  ;;  %vm314_vm0 = vcmask 261120   ;;  %v431_v0 = vld [vmem:[#allocation4 + $0x18] sm:$0xff]  ;;  %v430_v1 = vld [vmem:[#allocation4 + $0x10] sm:$0xff]  ;;  %s1170_s24 = smov 96  }
  0x39   : > { %442 = vrot.lane.b32.xlu0 %v431_v0, %s1170_s24  ;;  %440 = vrot.lane.b32.xlu1 %v430_v1, %s1170_s24  ;;  %v308_v2 = vld [vmem:[%s226_s14] sm:$0xff]  ;;  %s1171_s23 = smov 64   ;;  %v429_v3 = vld [vmem:[#allocation4 + $0x8] sm:$0xff]  ;;  %p279_p1 = scmp.lt.s32.totalorder %s1156_s18, 1  ;;  %vm396_vm1 = vcmask 64512  }
  0x3a   : > { %950 = vmatprep.subr.mxu0 %v431_v0  ;;  %958 = vmatprep.mubr.msk.f32.mxu0 %vm314_vm0, %v308_v2  ;;  %v428_v4 = vld [vmem:[#allocation4] sm:$0xff]  ;;  %v309_v5 = vld [vmem:[%s226_s14 + $0x8] sm:$0xff]  ;;  %s1172_s21 = smov 120   ;;  %s1174_s25 = smov 104  }
  0x3b   : > { %951 = vmatpush3.msra.mxu0 %v431_v0  ;;  %969 = vmatprep.mubr.msk.f32.mxu1 %vm314_vm0, %v308_v2  ;;  %s1432_s18 = smov (!%p279_p1, %s1156_s18), 1 }
  0x3c   : > { %952 = vmatprep.subr.mxu0 %v430_v1  ;;  %s929_s22 = sshll.u32 %s1432_s18, 6  ;;  %s1173_s18 = smov 112  }
  0x3d   : > { %568 = vrot.lane.b32.xlu0 %v431_v0, %s1171_s23  ;;  %566 = vrot.lane.b32.xlu1 %v430_v1, %s1171_s23  ;;  %s1318_s15 = scalar_lea.vmem %s1416_s2, %s929_s22  ;;  %s1333_s29 = scalar_lea.vmem %s1417_s3, %s929_s22 }
  0x3e   : > { %953 = vmatpush3.msra.mxu0 %v430_v1  ;;  %s1338_s8 = scalar_lea.vmem %s1418_s4, %s929_s22 }
  0x3f   : > { %954 = vmatprep.subr.mxu0 %v429_v3 }
  0x40   : > { %955 = vmatpush3.msra.mxu0 %v429_v3 }
  0x41   : > { %438 = vrot.lane.b32.xlu0 %v429_v3, %s1170_s24  ;;  %564 = vrot.lane.b32.xlu1 %v429_v3, %s1171_s23 }
  0x42   : > { %956 = vmatprep.subr.mxu0 %v428_v4 }
  0x43   : > { %957 = vmatpush3.msra.mxu0 %v428_v4 }
  0x44   : > { %959 = vmatmul.mubr.msk.f32.vlgmr.msra.gmra.mxu0 %vm314_vm0, %v309_v5 }
  0x45   : > { %436 = vrot.lane.b32.xlu0 %v428_v4, %s1170_s24  ;;  %562 = vrot.lane.b32.xlu1 %v428_v4, %s1171_s23 }
  0x46   : > { %980 = vmatprep.mubr.msk.f32.mxu0 %vm314_vm0, %v308_v2 }
  0xab   : > { %v443_v6 = vpop.permute.xlu0 %442  ;;  %v441_v7 = vpop.permute.xlu1 %440 }
  0xac   : > { %961 = vmatprep.subr.mxu1 %v443_v6 }
  0xad   : > { %962 = vmatpush3.msra.mxu1 %v443_v6 }
  0xae   : > { %963 = vmatprep.subr.mxu1 %v441_v7 }
  0xaf   : > { %v569_v8 = vpop.permute.xlu0 %568  ;;  %964 = vmatpush3.msra.mxu1 %v441_v7  ;;  %v567_v9 = vpop.permute.xlu1 %566 }
  0xb0   : > { %972 = vmatprep.subr.mxu0 %v569_v8 }
  0xb1   : > { %973 = vmatpush3.msra.mxu0 %v569_v8 }
  0xb2   : > { %974 = vmatprep.subr.mxu0 %v567_v9 }
  0xb3   : > { %v439_v10 = vpop.permute.xlu0 %438  ;;  %975 = vmatpush3.msra.mxu0 %v567_v9  ;;  %v565_v11 = vpop.permute.xlu1 %564 }
  0xb4   : > { %965 = vmatprep.subr.mxu1 %v439_v10  ;;  %976 = vmatprep.subr.mxu0 %v565_v11 }
  0xb5   : > { %966 = vmatpush3.msra.mxu1 %v439_v10  ;;  %977 = vmatpush3.msra.mxu0 %v565_v11 }
  0xb7   : > { %v437_v12 = vpop.permute.xlu0 %436  ;;  %v563_v13 = vpop.permute.xlu1 %562 }
  0xb8   : > { %967 = vmatprep.subr.mxu1 %v437_v12  ;;  %978 = vmatprep.subr.mxu0 %v563_v13 }
  0xb9   : > { %968 = vmatpush3.msra.mxu1 %v437_v12  ;;  %979 = vmatpush3.msra.mxu0 %v563_v13 }
  0xba   : > { %970 = vmatmul.mubr.msk.f32.vlgmr.msra.gmra.mxu1 %vm314_vm0, %v309_v5  ;;  %981 = vmatmul.mubr.msk.f32.vlgmr.msra.gmra.mxu0 %vm314_vm0, %v309_v5 }
 0x104   : > { %v960_v14 = vpop.f32.mrf.mxu0 }
 0x105   : > { %398 = vst.msk [vmem:[%s1318_s15 + $0x8] sm:$0xff] %vm396_vm1, %v960_v14  ;;  %403 = vrot.lane.b32.xlu1 %v960_v14, %s1172_s21 }
 0x106   : > { %v387_v15 = vpop.f32.mrf.mxu0 }
 0x107   : > { %397 = vst.msk [vmem:[%s1318_s15] sm:$0xff] %vm396_vm1, %v387_v15  ;;  %401 = vrot.lane.b32.xlu0 %v387_v15, %s1172_s21 }
 0x109   : > { %412 = vrot.lane.b32.xlu1 %v960_v14, %s1173_s18 }
 0x10b   : > { %410 = vrot.lane.b32.xlu0 %v387_v15, %s1173_s18 }
 0x10d   : > { %421 = vrot.lane.b32.xlu1 %v960_v14, %s1174_s25 }
 0x10f   : > { %419 = vrot.lane.b32.xlu0 %v387_v15, %s1174_s25 }
 0x177   : > { %v404_v16 = vpop.permute.xlu1 %403 }
 0x178   : > { %905 = vst.msk [vmem:[%s1318_s15 + $0x18] sm:$0xff] %vm396_vm1, %v404_v16 }
 0x179   : > { %v402_v17 = vpop.permute.xlu0 %401 }
 0x17a   : > { %v971_v18 = vpop.f32.mrf.mxu1  ;;  %v982_v19 = vpop.f32.mrf.mxu0  ;;  %904 = vst.msk [vmem:[%s1318_s15 + $0x10] sm:$0xff] %vm396_vm1, %v402_v17 }
 0x17b   : > { %524 = vst.msk [vmem:[%s1333_s29 + $0x8] sm:$0xff] %vm396_vm1, %v971_v18  ;;  %529 = vrot.lane.b32.xlu1 %v971_v18, %s1172_s21  ;;  %650 = vst.msk [vmem:[%s1338_s8 + $0x8] sm:$0xff] %vm396_vm1, %v982_v19  ;;  %v413_v20 = vpop.permute.xlu1 %412 }
 0x17c   : > { %v514_v21 = vpop.f32.mrf.mxu1  ;;  %v640_v22 = vpop.f32.mrf.mxu0  ;;  %907 = vst.msk [vmem:[%s1318_s15 + $0x28] sm:$0xff] %vm396_vm1, %v413_v20 }
 0x17d   : > { %523 = vst.msk [vmem:[%s1333_s29] sm:$0xff] %vm396_vm1, %v514_v21  ;;  %527 = vrot.lane.b32.xlu0 %v514_v21, %s1172_s21  ;;  %649 = vst.msk [vmem:[%s1338_s8] sm:$0xff] %vm396_vm1, %v640_v22  ;;  %v411_v23 = vpop.permute.xlu0 %410 }
 0x17e   : > { %906 = vst.msk [vmem:[%s1318_s15 + $0x20] sm:$0xff] %vm396_vm1, %v411_v23 }
 0x17f   : > { %538 = vrot.lane.b32.xlu1 %v971_v18, %s1173_s18  ;;  %v422_v24 = vpop.permute.xlu1 %421 }
 0x180   : > { %909 = vst.msk [vmem:[%s1318_s15 + $0x38] sm:$0xff] %vm396_vm1, %v422_v24 }
 0x181   : > { %536 = vrot.lane.b32.xlu0 %v514_v21, %s1173_s18  ;;  %v420_v25 = vpop.permute.xlu0 %419 }
 0x182   : > { %908 = vst.msk [vmem:[%s1318_s15 + $0x30] sm:$0xff] %vm396_vm1, %v420_v25 }
 0x183   : > { %547 = vrot.lane.b32.xlu1 %v971_v18, %s1174_s25 }
 0x185   : > { %545 = vrot.lane.b32.xlu0 %v514_v21, %s1174_s25 }
 0x187   : > { %655 = vrot.lane.b32.xlu1 %v982_v19, %s1172_s21 }
 0x189   : > { %653 = vrot.lane.b32.xlu0 %v640_v22, %s1172_s21 }
 0x18b   : > { %664 = vrot.lane.b32.xlu1 %v982_v19, %s1173_s18 }
 0x18d   : > { %662 = vrot.lane.b32.xlu0 %v640_v22, %s1173_s18 }
 0x18f   : > { %673 = vrot.lane.b32.xlu1 %v982_v19, %s1174_s25 }
 0x191   : > { %671 = vrot.lane.b32.xlu0 %v640_v22, %s1174_s25 }
 0x1ed   : > { %v530_v26 = vpop.permute.xlu1 %529 }
 0x1ee   : > { %913 = vst.msk [vmem:[%s1333_s29 + $0x18] sm:$0xff] %vm396_vm1, %v530_v26 }
 0x1ef   : > { %v528_v27 = vpop.permute.xlu0 %527 }
 0x1f0   : > { %912 = vst.msk [vmem:[%s1333_s29 + $0x10] sm:$0xff] %vm396_vm1, %v528_v27 }
 0x1f1   : > { %v539_v28 = vpop.permute.xlu1 %538 }
 0x1f2   : > { %915 = vst.msk [vmem:[%s1333_s29 + $0x28] sm:$0xff] %vm396_vm1, %v539_v28 }
 0x1f3   : > { %v537_v29 = vpop.permute.xlu0 %536 }
 0x1f4   : > { %914 = vst.msk [vmem:[%s1333_s29 + $0x20] sm:$0xff] %vm396_vm1, %v537_v29 }
 0x1f5   : > { %v548_v30 = vpop.permute.xlu1 %547 }
 0x1f6   : > { %917 = vst.msk [vmem:[%s1333_s29 + $0x38] sm:$0xff] %vm396_vm1, %v548_v30 }
 0x1f7   : > { %v546_v31 = vpop.permute.xlu0 %545 }
 0x1f8   : > { %916 = vst.msk [vmem:[%s1333_s29 + $0x30] sm:$0xff] %vm396_vm1, %v546_v31 }
 0x1f9   : > { %v656_v32 = vpop.permute.xlu1 %655 }
 0x1fa   : > { %921 = vst.msk [vmem:[%s1338_s8 + $0x18] sm:$0xff] %vm396_vm1, %v656_v32 }
 0x1fb   : > { %v654_v33 = vpop.permute.xlu0 %653 }
 0x1fc   : > { %920 = vst.msk [vmem:[%s1338_s8 + $0x10] sm:$0xff] %vm396_vm1, %v654_v33 }
 0x1fd   : > { %v665_v34 = vpop.permute.xlu1 %664 }
 0x1fe   : > { %923 = vst.msk [vmem:[%s1338_s8 + $0x28] sm:$0xff] %vm396_vm1, %v665_v34 }
 0x1ff   : > { %v663_v35 = vpop.permute.xlu0 %662 }
 0x200   : > { %922 = vst.msk [vmem:[%s1338_s8 + $0x20] sm:$0xff] %vm396_vm1, %v663_v35 }
 0x201   : > { %v674_v36 = vpop.permute.xlu1 %673 }
 0x202   : > { %925 = vst.msk [vmem:[%s1338_s8 + $0x38] sm:$0xff] %vm396_vm1, %v674_v36 }
 0x203   : > { %v672_v37 = vpop.permute.xlu0 %671 }
 0x204   : > { %924 = vst.msk [vmem:[%s1338_s8 + $0x30] sm:$0xff] %vm396_vm1, %v672_v37 }
 0x205 PF: > { %s19_s20 = sadd.s32 1, %s1164_s20   ;;  %s1424_s15 = smov %s1148_s16 }
 0x206   : > { %p16_p4 = scmp.ge.s32.totalorder %s19_s20, 4   ;;  %s1425_s16 = smov %s1152_s17 }
 0x207   : > { %s1426_s17 = smov %s1277_s13  ;;  %s1427_s18 = smov %s1160_s19 }
 0x208   : > { %s1428_s19 = smov %s1430_s28  ;;  %18 = sbr.rel (!%p16_p4) target bundleno = 5 (0x5), region = 105 }
 0x20d   :  { %760 = vsyncpa [#allocation3], 1 }
 0x20e   :  { %762 = vsyncpa [#allocation3 + $0x1], 1 }
 0x20f   :  { %763 = vsyncpa [#allocation5], 1 }

</bundles_post_ra>
